<compile_context>
chip_gen: v6e
topology: v6e:2x2x1
jax: 0.10.0
libtpu: 0.0.40
codegen_flags: <defaults>
</compile_context>

<pallas_src>
import jax
import jax.numpy as jnp
from jax.experimental import pallas as pl
from jax.experimental.pallas import tpu as pltpu


def _decoder_matmul_kernel(v_ref, w_ref, o_ref):
    # In-kernel cast of v to the compute dtype: VPU work hidden under the DMA,
    # avoids a separate wrapper cast pass over HBM.
    v = v_ref[...].astype(w_ref.dtype)
    o_ref[...] = jnp.dot(
        v, w_ref[...], preferred_element_type=jnp.float32
    ).astype(o_ref.dtype)


def choose_pack_factor(batch_rows, K, N, *, max_pack=8, itemsize=2,
                       max_weight_bytes=4 * 2**20):
    """Smallest p dividing batch_rows that makes (p*K, p*N) lane-dense (x128).

    The kron expansion inflates the weight by p**2, so p is also capped by a
    weight-slab byte budget (VMEM hygiene, esp. v7x 64 MiB physical VMEM).
    """
    def weight_ok(p):
        return p * p * K * N * itemsize <= max_weight_bytes

    for p in (1, 2, 4, 8):
        if p > max_pack or not weight_ok(p):
            break
        if batch_rows % p == 0 and (p * K) % 128 == 0 and (p * N) % 128 == 0:
            return p
    # Fall back: at least make the output lane-dense (biggest measured lever).
    for p in (1, 2, 4, 8):
        if p > max_pack or not weight_ok(p):
            break
        if batch_rows % p == 0 and (p * N) % 128 == 0:
            return p
    return 1


def prepare_decoder_weight(decoder_matrix, *, pack=1, compute_dtype=jnp.bfloat16):
    """(num_steps, in_dim, n, d) -> (pack*K, pack*N) matmul weight.

    Pure function of the parameter.  Call once (e.g. at module init), keep the
    result, and pass it as prepared_weight= to knf_decoder_forward so the
    reshape/transpose/kron/cast does not run per forward call.
    """
    num_steps, in_dim, n_meas, in_dim2 = decoder_matrix.shape
    K = n_meas * in_dim2
    N = num_steps * in_dim
    w = decoder_matrix.reshape(N, K).T  # (K, N): contraction dim first
    if pack > 1:
        # out_packed = v_packed @ kron(I_p, W): p logical rows per packed row.
        w = jnp.kron(jnp.eye(pack, dtype=w.dtype), w)
    return w.astype(compute_dtype)


def _detect_num_tensorcores():
    """Best-effort TensorCores-per-chip (2 on v7x, 1 on v5e/v6e); default 1."""
    try:
        info = pltpu.get_tpu_info()
        for attr in ("num_cores", "num_tensorcores", "tensorcore_count",
                     "cores_per_chip"):
            val = getattr(info, attr, None)
            if isinstance(val, int) and val >= 1:
                return val
    except Exception:
        pass
    try:
        val = getattr(jax.devices()[0], "num_cores", None)
        if isinstance(val, int) and val >= 1:
            return val
    except Exception:
        pass
    return 1


def _choose_block_rows(rows, max_block_rows, fits, num_tensorcores):
    """Largest legal M tile fitting the VMEM budget; v7x-only megacore split."""
    if rows <= max_block_rows and fits(rows):
        block_rows = rows  # full extent: always a legal block shape
    else:
        # Descending powers of two (all multiples of 8 -> legal sublane dims);
        # pick the largest that fits the VMEM budget.
        block_rows = 8
        while block_rows * 2 <= min(rows, max_block_rows):
            block_rows *= 2
        while block_rows > 8 and not fits(block_rows):
            block_rows //= 2

    # Megacore: only chips with >=2 TensorCores (v7x) benefit from splitting a
    # single big tile across the grid; never shrink below 512 rows (per-step
    # overhead).  v5e/v6e (1 TC) keep the big tile -- the grid is a serial loop.
    if num_tensorcores >= 2 and pl.cdiv(rows, block_rows) < num_tensorcores:
        for cand in (1024, 512):
            if cand < block_rows and pl.cdiv(rows, cand) >= num_tensorcores:
                block_rows = cand
                break

    return max(1, min(block_rows, rows))


def knf_decoder_forward(
    v,
    decoder_matrix,
    *,
    prepared_weight=None,
    pack=None,
    out_dtype=None,
    compute_dtype=jnp.bfloat16,
    max_pack=8,
    max_block_rows=1024,
    vmem_budget_bytes=14 * 2**20,
    num_tensorcores=None,
):
    """v: (..., n_measurements, in_dim); decoder_matrix: (num_steps, in_dim, n, in_dim).

    Pass prepared_weight= (from prepare_decoder_weight) to hoist weight prep
    out of the per-call path.  Pass out_dtype=jnp.bfloat16 to halve writeback
    traffic if the consumer tolerates it; compute_dtype=jnp.float32 (with a
    float32 prepared weight) gives strict f32 parity with the PyTorch module.
    """
    num_steps, in_dim, n_meas, in_dim2 = decoder_matrix.shape
    assert in_dim == in_dim2
    *lead, n, d = v.shape
    assert (n, d) == (n_meas, in_dim), (v.shape, decoder_matrix.shape)

    K = n_meas * in_dim
    N = num_steps * in_dim
    B = 1
    for s in lead:
        B *= s

    if out_dtype is None:
        out_dtype = v.dtype  # module parity; pass bf16 explicitly for less HBM

    if prepared_weight is None:
        if pack is None:
            pack = choose_pack_factor(
                B, K, N, max_pack=max_pack,
                itemsize=jnp.dtype(compute_dtype).itemsize)
        # NOTE: when decoder_matrix is a traced jit argument this prep runs per
        # call; hoist it by passing prepared_weight= instead.
        w_packed = prepare_decoder_weight(
            decoder_matrix, pack=pack, compute_dtype=compute_dtype)
    else:
        w_packed = prepared_weight
        if pack is None:
            pack = w_packed.shape[0] // K

    p = pack
    Kp, Np = p * K, p * N
    assert B % p == 0 and w_packed.shape == (Kp, Np), (w_packed.shape, p, K, N)
    rows = B // p

    # Free row-major view: p logical rows per packed row.  No dtype cast here:
    # v enters the kernel at its native width and is cast on the VPU inside.
    v_packed = v.reshape(rows, Kp)

    v_itemsize = jnp.dtype(v_packed.dtype).itemsize
    out_itemsize = jnp.dtype(out_dtype).itemsize
    w_bytes = Kp * Np * jnp.dtype(w_packed.dtype).itemsize  # single-buffered

    def footprint(br):
        # double-buffered v tile + resident weight + double-buffered out tile
        return 2 * br * Kp * v_itemsize + w_bytes + 2 * br * Np * out_itemsize

    def fits(br):
        return footprint(br) <= vmem_budget_bytes

    if num_tensorcores is None:
        num_tensorcores = _detect_num_tensorcores()
    block_rows = _choose_block_rows(rows, max_block_rows, fits, num_tensorcores)
    grid = (pl.cdiv(rows, block_rows),)

    est_bytes = footprint(block_rows)
    vmem_limit = None
    if est_bytes > 10 * 2**20:
        # Raise the scoped-VMEM limit explicitly (v5e defaults to 16 MiB) with
        # ~50% headroom for compiler scratch.
        vmem_limit = int(min(est_bytes * 3 // 2 + (1 << 20), 100 * 2**20))

    out_packed = pl.pallas_call(
        _decoder_matmul_kernel,
        out_shape=jax.ShapeDtypeStruct((rows, Np), out_dtype),
        grid_spec=pltpu.PrefetchScalarGridSpec(
            num_scalar_prefetch=0,
            grid=grid,
            in_specs=[
                # TODO(synk): pipeline_mode=pl.Buffered(3) here if profiling on
                # real v5e shapes shows exposed input DMA at step boundaries.
                pl.BlockSpec((block_rows, Kp), lambda i: (i, 0)),
                # Resident weight slab: constant block index, single-buffered
                # so the (kron-expanded) slab isn't duplicated in VMEM.
                pl.BlockSpec((Kp, Np), lambda i: (0, 0),
                             pipeline_mode=pl.Buffered(1)),
            ],
            out_specs=pl.BlockSpec((block_rows, Np), lambda i: (i, 0)),
        ),
        compiler_params=pltpu.CompilerParams(
            dimension_semantics=("parallel",),
            vmem_limit_bytes=vmem_limit,
        ),
    )(v_packed, w_packed)

    # (rows, p*N) is bit-identical to (B, N) in row-major -> free reshape back.
    return out_packed.reshape(*lead, num_steps, in_dim)


if __name__ == "__main__":
    # Module hyperparameters (small, consistent with the forward semantics).
    in_dim = 8
    num_steps = 8
    n_measurements = 4

    key = jax.random.PRNGKey(0)
    k_w, k_v = jax.random.split(key)

    decoder_matrix = (
        jax.random.normal(
            k_w, (num_steps, in_dim, n_measurements, in_dim), dtype=jnp.float32
        )
        * 0.01
    )
    v = jax.random.normal(
        k_v, (2, 8, n_measurements, in_dim), dtype=jnp.float32
    )

    B = 2 * 8
    K = n_measurements * in_dim
    N = num_steps * in_dim

    # Hoisted weight prep: done once, outside the per-call path.
    pack = choose_pack_factor(B, K, N)
    w_bf16 = prepare_decoder_weight(decoder_matrix, pack=pack,
                                    compute_dtype=jnp.bfloat16)

    static = ("pack", "out_dtype", "compute_dtype", "max_pack",
              "max_block_rows", "vmem_budget_bytes", "num_tensorcores")
    fwd = jax.jit(knf_decoder_forward, static_argnames=static)

    # Default path: bf16 compute, f32 accumulation, output dtype == v.dtype.
    out = jax.block_until_ready(
        fwd(v, decoder_matrix, prepared_weight=w_bf16, pack=pack))
    assert out.shape == (2, 8, num_steps, in_dim), out.shape
    assert out.dtype == v.dtype, out.dtype

    # Tight check against what the kernel computes: bf16-rounded operands,
    # f32 accumulation.
    v_bf = v.astype(jnp.bfloat16).astype(jnp.float32)
    w_bf = decoder_matrix.astype(jnp.bfloat16).astype(jnp.float32)
    ref_mixed = jnp.einsum("...nd,ijnd->...ij", v_bf, w_bf)
    assert jnp.allclose(out, ref_mixed, atol=1e-5, rtol=1e-5), float(
        jnp.max(jnp.abs(out - ref_mixed))
    )

    # Loose check against the full-f32 module semantics (bf16 rounding only).
    ref_f32 = jnp.einsum("...nd,ijnd->...ij", v, decoder_matrix)
    assert jnp.allclose(out, ref_f32, atol=5e-3, rtol=5e-2), float(
        jnp.max(jnp.abs(out - ref_f32))
    )

    # bf16-output path (halves the dominant writeback traffic).
    out_bf16 = jax.block_until_ready(
        fwd(v, decoder_matrix, prepared_weight=w_bf16, pack=pack,
            out_dtype=jnp.bfloat16))
    assert out_bf16.dtype == jnp.bfloat16
    assert jnp.allclose(out_bf16.astype(jnp.float32), ref_mixed,
                        atol=5e-3, rtol=5e-2)

    # Strict-parity path: full f32 compute (tolerance covers MXU precision
    # defaults on both the kernel and the reference einsum).
    w_f32 = prepare_decoder_weight(decoder_matrix, pack=pack,
                                   compute_dtype=jnp.float32)
    out_f32 = jax.block_until_ready(
        fwd(v, decoder_matrix, prepared_weight=w_f32, pack=pack,
            compute_dtype=jnp.float32))
    assert out_f32.dtype == jnp.float32
    assert jnp.allclose(out_f32, ref_f32, atol=1e-3, rtol=1e-2), float(
        jnp.max(jnp.abs(out_f32 - ref_f32))
    )

    print("KERNEL_OK")
</pallas_src>

<mosaic_0001>
module attributes {stable_mosaic.version = 11 : i64} {
  func.func @_decoder_matmul_kernel(%arg0: i32, %arg1: memref<4x128xf32, #tpu.memory_space<vmem>>, %arg2: memref<128x256xbf16, #tpu.memory_space<vmem>>, %arg3: memref<4x256xf32, #tpu.memory_space<vmem>>) attributes {dimension_semantics = [#tpu.dimension_semantics<parallel>], iteration_bounds = array<i64: 1>, scalar_prefetch = 0 : i64, scratch_operands = 0 : i64, tpu.core_type = #tpu.core_type<tc>, window_params = [{transform_indices = @transform_0, window_bounds = array<i64: 4, 128>}, {pipeline_mode = #tpu.pipeline_mode<synchronous>, transform_indices = @transform_1, window_bounds = array<i64: 128, 256>}, {transform_indices = @transform_2, window_bounds = array<i64: 4, 256>}]} {
    %c0 = arith.constant 0 : index
    %c0_0 = arith.constant 0 : index
    %0 = vector.load %arg1[%c0, %c0_0] : memref<4x128xf32, #tpu.memory_space<vmem>>, vector<4x128xf32>
    %1 = arith.truncf %0 : vector<4x128xf32> to vector<4x128xbf16>
    %c0_1 = arith.constant 0 : index
    %c0_2 = arith.constant 0 : index
    %2 = vector.load %arg2[%c0_1, %c0_2] : memref<128x256xbf16, #tpu.memory_space<vmem>>, vector<128x256xbf16>
    %cst = arith.constant dense<0.000000e+00> : vector<4x256xf32>
    %3 = tpu.matmul %1, %2, %cst {dimension_numbers = #tpu.dot_dimension_numbers<[1], [0], [0], [1], [0, 0, 1, 1], [], []>} : vector<4x128xbf16>, vector<128x256xbf16>, vector<4x256xf32> -> vector<4x256xf32>
    %c0_3 = arith.constant 0 : index
    %c0_4 = arith.constant 0 : index
    %4 = vector.load %arg3[%c0_3, %c0_4] : memref<4x256xf32, #tpu.memory_space<vmem>>, vector<4x256xf32>
    tpu.vector_store %arg3[%c0_3, %c0_4], %3 {strides = array<i32>} : memref<4x256xf32, #tpu.memory_space<vmem>>, vector<4x256xf32>,
    return
  }
  func.func @transform_0(%arg0: i32) -> (i32, i32) {
    %c0_i32 = arith.constant 0 : i32
    %c0_i32_0 = arith.constant 0 : i32
    return %arg0, %c0_i32 : i32, i32
  }
  func.func @transform_1(%arg0: i32) -> (i32, i32) {
    %c0_i32 = arith.constant 0 : i32
    %c0_i32_0 = arith.constant 0 : i32
    %c0_i32_1 = arith.constant 0 : i32
    return %c0_i32, %c0_i32_0 : i32, i32
  }
  func.func @transform_2(%arg0: i32) -> (i32, i32) {
    %c0_i32 = arith.constant 0 : i32
    %c0_i32_0 = arith.constant 0 : i32
    return %arg0, %c0_i32 : i32, i32
  }
}

</mosaic_0001>

<bundles_post_ra>
// kernel: knf_decoder_forward.1
= control target key start
LH: loop header
LB: loop body
LE: loop exit
PB: predicated region body
PF: predicated region fallthrough
CT: control target
= control target key end

     0   :  { %7 = vsyncpa [#allocation3], 0  ;;  %s241_s9 = smov [#allocation2]   ;;  %s269_s0 = inlined_call_operand.vmem [shape: f32[4,128], index: 0, kind: input, shape index: {}]   ;;  %s270_s1 = inlined_call_operand.hbm [shape: bf16[128,256], index: 1, kind: input, shape index: {}]   ;;  %s271_s2 = inlined_call_operand.vmem [shape: f32[4,256], index: 2, kind: output, shape index: {}]  }
   0x1   :  { %s15_s10 = sshll.u32 %s241_s9, 4  ;;  %s16_s10 = int_to_ptr.vmem [resolvable:$true] %s15_s10 }
   0x2   :  { %s227_s11 = scalar_lea.vmem %s16_s10, 2048  ;;  %p232_p1 = scmp.lt.s32.totalorder %s16_s10, %s16_s10 }
   0x3   :  { %p228_p0 = scmp.ne.s32.totalorder %s16_s10, %s227_s11  ;;  %p233_p2 = scmp.lt.s32.totalorder %s227_s11, %s227_s11 }
   0x5   :  { %p234_p3 = por %p233_p2, %p232_p1 }
   0x7   :  { %p235_p4 = pnand %p234_p3, %p228_p0 }
   0x9   :  { %238 = shalt.err (!%p235_p4)
}
   0xa   :  { %s242_s12 = smov 128   ;;  %s243_s13 = smov 8  }
   0xb   :  { %21 = dma.hbm_to_vmem [thread:$0]  %s270_s1, 2048, %s16_s10, [#allocation3], %s242_s12, %s242_s12, %s243_s13  }
   0xc   :  { %239 = dma.done.wait [#allocation3], 2048  }
   0xd   :  { %240 = vsyncadd [#allocation3], 4294965248  ;;  %v244_v0 = vmov 0   ;;  %v195_v1 = vld [vmem:[#allocation2 + $0x74] ss:$8 sps:$4 sm:$0xff]  }
   0xe   :  { %156 = vmatprep.mubr.bf16.mxu0 %v244_v0  ;;  %v197_v2 = vld [vmem:[#allocation2 + $0x70] ss:$8 sps:$4 sm:$0xff]   ;;  %124 = vmatprep.subr.bf16.mxu0 %v195_v1  ;;  %v198_v3 = vld [vmem:[#allocation2 + $0x64] ss:$8 sps:$4 sm:$0xff]   ;;  %v200_v4 = vld [vmem:[#allocation2 + $0x60] ss:$8 sps:$4 sm:$0xff]  }
   0xf   :  { %125 = vmatpush1.bf16.msra.mxu0 %v197_v2  ;;  %v201_v5 = vld [vmem:[#allocation2 + $0x54] ss:$8 sps:$4 sm:$0xff]   ;;  %v203_v6 = vld [vmem:[#allocation2 + $0x50] ss:$8 sps:$4 sm:$0xff]   ;;  %v204_v7 = vld [vmem:[#allocation2 + $0x44] ss:$8 sps:$4 sm:$0xff]  }
  0x10   :  { %126 = vmatprep.subr.bf16.mxu0 %v198_v3  ;;  %v206_v8 = vld [vmem:[#allocation2 + $0x40] ss:$8 sps:$4 sm:$0xff]   ;;  %v207_v9 = vld [vmem:[#allocation2 + $0x34] ss:$8 sps:$4 sm:$0xff]   ;;  %v209_v10 = vld [vmem:[#allocation2 + $0x30] ss:$8 sps:$4 sm:$0xff]  }
  0x11   :  { %v210_v11 = vld [vmem:[#allocation2 + $0x24] ss:$8 sps:$4 sm:$0xff]   ;;  %v212_v12 = vld [vmem:[#allocation2 + $0x20] ss:$8 sps:$4 sm:$0xff]   ;;  %v213_v13 = vld [vmem:[#allocation2 + $0x14] ss:$8 sps:$4 sm:$0xff]  }
  0x12   :  { %v215_v14 = vld [vmem:[#allocation2 + $0x10] ss:$8 sps:$4 sm:$0xff]   ;;  %v216_v15 = vld [vmem:[#allocation2 + $0x4] ss:$8 sps:$4 sm:$0xff]   ;;  %v218_v16 = vld [vmem:[#allocation2] ss:$8 sps:$4 sm:$0xff]  }
  0x13   :  { %127 = vmatpush1.bf16.msra.mxu0 %v200_v4  ;;  %v26_v17 = vld [vmem:[%s269_s0] sm:$0xf] }
  0x14   :  { %128 = vmatprep.subr.bf16.mxu0 %v201_v5  ;;  %v27_v18 = vpack.c.bf16 %v26_v17, %v26_v17 }
  0x17   :  { %129 = vmatpush1.bf16.msra.mxu0 %v203_v6 }
  0x18   :  { %130 = vmatprep.subr.bf16.mxu0 %v204_v7 }
  0x1b   :  { %131 = vmatpush1.bf16.msra.mxu0 %v206_v8 }
  0x1c   :  { %132 = vmatprep.subr.bf16.mxu0 %v207_v9 }
  0x1f   :  { %133 = vmatpush1.bf16.msra.mxu0 %v209_v10 }
  0x20   :  { %134 = vmatprep.subr.bf16.mxu0 %v210_v11 }
  0x23   :  { %135 = vmatpush1.bf16.msra.mxu0 %v212_v12 }
  0x24   :  { %136 = vmatprep.subr.bf16.mxu0 %v213_v13 }
  0x27   :  { %137 = vmatpush1.bf16.msra.mxu0 %v215_v14 }
  0x28   :  { %138 = vmatprep.subr.bf16.mxu0 %v216_v15 }
  0x2b   :  { %139 = vmatpush1.bf16.msra.mxu0 %v218_v16 }
  0x2e   :  { %157 = vmatmul.mubr.bf16.vlgmr.msra.gmra.mxu0 %v27_v18 }
  0xee   :  { %v158_v19 = vpop.f32.mrf.mxu0 }
  0xf0   :  { %v160_v20 = vpop.f32.mrf.mxu0 }
  0xf1   :  { %v167_v21 = vcombine.low %v158_v19, %v160_v20 }
  0xf2   :  { %v162_v22 = vpop.f32.mrf.mxu0 }
  0xf3   :  { %169 = vst [vmem:[%s271_s2] sm:$0xff] %v167_v21 }
  0xf4   :  { %v163_v23 = vpop.f32.mrf.mxu0 }
  0xf5   :  { %174 = vsyncpa [#allocation3], 1 }

</bundles_post_ra>
